<compile_context>
chip_gen: v5e
topology: v5e:2x2
jax: 0.10.0
libtpu: 0.0.40
codegen_flags: <defaults>
</compile_context>

<pallas_src>
import functools

import jax
import jax.numpy as jnp
from jax.experimental import pallas as pl
from jax.experimental.pallas import tpu as pltpu


def _round_up(a, b):
    return (a + b - 1) // b * b


# ---------------------------------------------------------------------------
# Kernel 1: (TM, K) @ (K, Ep) + bias, then LayerNorm over the real E channels.
# Ep is the 128-lane-padded channel count; padded columns of w/b/gamma/beta
# are zero, so sums over the full Ep lanes equal sums over the real E channels
# (variance uses E[x^2] - mean^2 so zero-padded lanes contribute nothing).
# ---------------------------------------------------------------------------
def _proj_ln_kernel(x_ref, w_ref, b_ref, g_ref, bb_ref, o_ref, *, e_real, eps):
    acc = jnp.dot(x_ref[...], w_ref[...], preferred_element_type=jnp.float32)
    acc = acc + b_ref[...]
    inv_e = 1.0 / float(e_real)
    mean = jnp.sum(acc, axis=-1, keepdims=True) * inv_e
    mean_sq = jnp.sum(acc * acc, axis=-1, keepdims=True) * inv_e
    var = mean_sq - mean * mean
    inv_std = jax.lax.rsqrt(var + eps)
    o_ref[...] = ((acc - mean) * inv_std * g_ref[...] + bb_ref[...]).astype(o_ref.dtype)


# ---------------------------------------------------------------------------
# Kernel 2: depthwise 7x7 conv, NHWC, channels on lanes (Ep = 128-padded).
# Input is spatially pre-padded by 3 on each side; the conv is 49 shifted
# multiply-accumulates on the VPU (no cross-channel mixing).
# ---------------------------------------------------------------------------
def _dwconv_kernel(x_ref, w_ref, b_ref, o_ref):
    # x: (Hp+6, Wp+6, Ep), w: (49, Ep), b: (1, Ep), o: (Hp, Wp, Ep)
    hp, wp, ep = o_ref.shape
    acc = jnp.broadcast_to(b_ref[...].reshape(1, 1, ep), (hp, wp, ep)).astype(jnp.float32)
    for di in range(7):
        for dj in range(7):
            tap = w_ref[di * 7 + dj].reshape(1, 1, ep)
            acc = acc + x_ref[di:di + hp, dj:dj + wp, :] * tap
    o_ref[...] = acc.astype(o_ref.dtype)


def down_non_forward(x, proj_w, proj_b, norm_w, norm_b, dw_w, dw_b,
                     *, eps=1e-6, matmul_dtype=None):
    """Down_non forward.  x: (B, C, H, W) NCHW -> (B, E, H//2, W//2) NCHW.

    proj_w: (E, C, 2, 2), proj_b: (E,)      -- DownLayer conv (k=2, s=2)
    norm_w/norm_b: (E,)                     -- LayerNorm(eps=1e-6)
    dw_w: (E, 1, 7, 7), dw_b: (E,)          -- depthwise 7x7 conv, padding 3
    matmul_dtype: optionally jnp.bfloat16 to halve matmul-input DMA bytes on
    v6e/v7x (accumulation stays f32); default None keeps f32 inputs.
    pos_drop (Dropout, p=drop_rate=0.0) is an identity in the forward pass.
    """
    out_dtype = x.dtype
    B, C, H, W = x.shape
    E, _, p, _ = proj_w.shape
    Hp, Wp = H // p, W // p
    N = Hp * Wp
    M = B * N
    K = C * p * p
    Ep = _round_up(E, 128)                 # lane-dense channel dimension

    # --- glue: non-overlapping patch extraction, columns ordered (C, ph, pw).
    # allow_input_fusion below lets XLA fuse this transpose into the kernel's
    # input fetch rather than materialising it as a separate HBM pass.
    patches = x.reshape(B, C, Hp, p, Wp, p)
    patches = jnp.transpose(patches, (0, 2, 4, 1, 3, 5)).reshape(M, K)

    # conv weight (E, C, p, p) -> dense (K, Ep), zero-padded to 128 lanes.
    w_mat = jnp.pad(proj_w.reshape(E, K).T, ((0, 0), (0, Ep - E)))
    b_row = jnp.pad(proj_b.reshape(1, E), ((0, 0), (0, Ep - E)))
    g_row = jnp.pad(norm_w.reshape(1, E), ((0, 0), (0, Ep - E)))
    be_row = jnp.pad(norm_b.reshape(1, E), ((0, 0), (0, Ep - E)))

    if matmul_dtype is not None:            # optional bf16 MXU inputs
        patches = patches.astype(matmul_dtype)
        w_mat = w_mat.astype(matmul_dtype)

    # --- row tiling: large tiles amortise per-grid-step overhead; rows are
    # padded up to the tile so any B*N works (no divisibility assert).
    TM = min(512, _round_up(M, 8))
    M_pad = _round_up(M, TM)
    if M_pad != M:
        patches = jnp.pad(patches, ((0, M_pad - M), (0, 0)))

    y = pl.pallas_call(
        functools.partial(_proj_ln_kernel, e_real=E, eps=eps),
        out_shape=jax.ShapeDtypeStruct((M_pad, Ep), out_dtype),
        grid_spec=pltpu.PrefetchScalarGridSpec(
            num_scalar_prefetch=0,
            grid=(M_pad // TM,),
            in_specs=[
                pl.BlockSpec((TM, K), lambda i: (i, 0)),
                pl.BlockSpec((K, Ep), lambda i: (0, 0)),
                pl.BlockSpec((1, Ep), lambda i: (0, 0)),
                pl.BlockSpec((1, Ep), lambda i: (0, 0)),
                pl.BlockSpec((1, Ep), lambda i: (0, 0)),
            ],
            out_specs=pl.BlockSpec((TM, Ep), lambda i: (i, 0)),
        ),
        compiler_params=pltpu.CompilerParams(
            dimension_semantics=("parallel",),
            # allow the patch-extraction transpose (input 0) to fuse into the
            # Pallas input fetch; weights/bias stay as-is.
            allow_input_fusion=[True, False, False, False, False],
        ),
    )(patches, w_mat, b_row, g_row, be_row)

    # --- NHWC, lane-dense; drop row padding, keep zero channel padding.
    y = y[:M].reshape(B, Hp, Wp, Ep)

    # --- depthwise 7x7 conv (padding=3) in NHWC.
    y_sp = jnp.pad(y, ((0, 0), (3, 3), (3, 3), (0, 0)))
    w49 = jnp.pad(dw_w.reshape(E, 49).T, ((0, 0), (0, Ep - E)))     # (49, Ep)
    db_row = jnp.pad(dw_b.reshape(1, E), ((0, 0), (0, Ep - E)))

    out_nhwc = pl.pallas_call(
        _dwconv_kernel,
        out_shape=jax.ShapeDtypeStruct((B, Hp, Wp, Ep), out_dtype),
        grid_spec=pltpu.PrefetchScalarGridSpec(
            num_scalar_prefetch=0,
            grid=(B,),
            in_specs=[
                pl.BlockSpec((None, Hp + 6, Wp + 6, Ep), lambda b: (b, 0, 0, 0)),
                pl.BlockSpec((49, Ep), lambda b: (0, 0)),
                pl.BlockSpec((1, Ep), lambda b: (0, 0)),
            ],
            out_specs=pl.BlockSpec((None, Hp, Wp, Ep), lambda b: (b, 0, 0, 0)),
        ),
        compiler_params=pltpu.CompilerParams(
            dimension_semantics=("parallel",)),
    )(y_sp, w49, db_row)

    # --- back to the PyTorch NCHW output layout; drop channel padding.
    out = jnp.transpose(out_nhwc[..., :E], (0, 3, 1, 2))
    return out


def reference_forward(x, proj_w, proj_b, norm_w, norm_b, dw_w, dw_b, eps=1e-6):
    """Pure-JAX reference for Down_non.forward (dropout p=0 -> identity)."""
    E, _, p, _ = proj_w.shape
    y = jax.lax.conv_general_dilated(
        x, proj_w, (p, p), "VALID",
        dimension_numbers=("NCHW", "OIHW", "NCHW"),
        precision=jax.lax.Precision.HIGHEST)
    y = y + proj_b.reshape(1, -1, 1, 1)
    B, _, Hp, Wp = y.shape
    t = y.reshape(B, E, Hp * Wp).transpose(0, 2, 1)                 # (B, N, E)
    mean = jnp.mean(t, axis=-1, keepdims=True)
    var = jnp.mean((t - mean) ** 2, axis=-1, keepdims=True)
    t = (t - mean) / jnp.sqrt(var + eps) * norm_w + norm_b
    t = t.reshape(B, Hp, Wp, E).transpose(0, 3, 1, 2)               # (B, E, Hp, Wp)
    out = jax.lax.conv_general_dilated(
        t, dw_w, (1, 1), ((3, 3), (3, 3)),
        dimension_numbers=("NCHW", "OIHW", "NCHW"),
        feature_group_count=E,
        precision=jax.lax.Precision.HIGHEST)
    return out + dw_b.reshape(1, -1, 1, 1)


if __name__ == "__main__":
    # Down_non(in_chns=4, out_chns=32, size=16): x (2, 4, 16, 16) -> (2, 32, 8, 8)
    B, C, H, W = 2, 4, 16, 16
    E = 32

    key = jax.random.PRNGKey(0)
    kx, kw, kb, kg, kbe, kdw, kdb = jax.random.split(key, 7)
    x = jax.random.normal(kx, (B, C, H, W), dtype=jnp.float32)
    proj_w = 0.1 * jax.random.normal(kw, (E, C, 2, 2), dtype=jnp.float32)
    proj_b = 0.01 * jax.random.normal(kb, (E,), dtype=jnp.float32)
    norm_w = 1.0 + 0.05 * jax.random.normal(kg, (E,), dtype=jnp.float32)
    norm_b = 0.05 * jax.random.normal(kbe, (E,), dtype=jnp.float32)
    dw_w = 0.05 * jax.random.normal(kdw, (E, 1, 7, 7), dtype=jnp.float32)
    dw_b = 0.01 * jax.random.normal(kdb, (E,), dtype=jnp.float32)

    out = down_non_forward(x, proj_w, proj_b, norm_w, norm_b, dw_w, dw_b)
    out = jax.block_until_ready(out)

    ref = reference_forward(x, proj_w, proj_b, norm_w, norm_b, dw_w, dw_b)
    assert out.shape == (B, E, H // 2, W // 2)
    assert jnp.allclose(out, ref, atol=1e-3, rtol=1e-3), \
        float(jnp.max(jnp.abs(out - ref)))

    print("KERNEL_OK")
</pallas_src>

<mosaic_0001>
module attributes {stable_mosaic.version = 11 : i64} {
  func.func @_proj_ln_kernel(%arg0: i32, %arg1: memref<128x16xf32, #tpu.memory_space<vmem>>, %arg2: memref<16x128xf32, #tpu.memory_space<vmem>>, %arg3: memref<1x128xf32, #tpu.memory_space<vmem>>, %arg4: memref<1x128xf32, #tpu.memory_space<vmem>>, %arg5: memref<1x128xf32, #tpu.memory_space<vmem>>, %arg6: memref<128x128xf32, #tpu.memory_space<vmem>>) attributes {dimension_semantics = [#tpu.dimension_semantics<parallel>], iteration_bounds = array<i64: 1>, scalar_prefetch = 0 : i64, scratch_operands = 0 : i64, tpu.core_type = #tpu.core_type<tc>, window_params = [{transform_indices = @transform_0, window_bounds = array<i64: 128, 16>}, {pipeline_mode = #tpu.pipeline_mode<synchronous>, transform_indices = @transform_1, window_bounds = array<i64: 16, 128>}, {pipeline_mode = #tpu.pipeline_mode<synchronous>, transform_indices = @transform_2, window_bounds = array<i64: 1, 128>}, {pipeline_mode = #tpu.pipeline_mode<synchronous>, transform_indices = @transform_3, window_bounds = array<i64: 1, 128>}, {pipeline_mode = #tpu.pipeline_mode<synchronous>, transform_indices = @transform_4, window_bounds = array<i64: 1, 128>}, {transform_indices = @transform_5, window_bounds = array<i64: 128, 128>}]} {
    %c0 = arith.constant 0 : index
    %c0_0 = arith.constant 0 : index
    %0 = vector.load %arg1[%c0, %c0_0] : memref<128x16xf32, #tpu.memory_space<vmem>>, vector<128x16xf32>
    %c0_1 = arith.constant 0 : index
    %c0_2 = arith.constant 0 : index
    %1 = vector.load %arg2[%c0_1, %c0_2] : memref<16x128xf32, #tpu.memory_space<vmem>>, vector<16x128xf32>
    %cst = arith.constant dense<0.000000e+00> : vector<128x128xf32>
    %2 = tpu.matmul %0, %1, %cst {dimension_numbers = #tpu.dot_dimension_numbers<[1], [0], [0], [1], [0, 0, 1, 1], [], []>} : vector<128x16xf32>, vector<16x128xf32>, vector<128x128xf32> -> vector<128x128xf32>
    %c0_3 = arith.constant 0 : index
    %c0_4 = arith.constant 0 : index
    %3 = vector.load %arg3[%c0_3, %c0_4] : memref<1x128xf32, #tpu.memory_space<vmem>>, vector<1x128xf32>
    %4 = vector.broadcast %3 : vector<1x128xf32> to vector<128x128xf32>
    %5 = arith.addf %2, %4 : vector<128x128xf32>
    %cst_5 = arith.constant dense<0.000000e+00> : vector<128xf32>
    %6 = vector.multi_reduction <add>, %5, %cst_5 [1] : vector<128x128xf32> to vector<128xf32>
    %7 = vector.shape_cast %6 : vector<128xf32> to vector<128x1xf32>
    %cst_6 = arith.constant 3.125000e-02 : f32
    %8 = vector.broadcast %cst_6 : f32 to vector<128x1xf32>
    %9 = arith.mulf %7, %8 : vector<128x1xf32>
    %10 = arith.mulf %5, %5 : vector<128x128xf32>
    %cst_7 = arith.constant dense<0.000000e+00> : vector<128xf32>
    %11 = vector.multi_reduction <add>, %10, %cst_7 [1] : vector<128x128xf32> to vector<128xf32>
    %12 = vector.shape_cast %11 : vector<128xf32> to vector<128x1xf32>
    %cst_8 = arith.constant 3.125000e-02 : f32
    %13 = vector.broadcast %cst_8 : f32 to vector<128x1xf32>
    %14 = arith.mulf %12, %13 : vector<128x1xf32>
    %15 = arith.mulf %9, %9 : vector<128x1xf32>
    %16 = arith.subf %14, %15 : vector<128x1xf32>
    %cst_9 = arith.constant 9.99999997E-7 : f32
    %17 = vector.broadcast %cst_9 : f32 to vector<128x1xf32>
    %18 = arith.addf %16, %17 : vector<128x1xf32>
    %19 = math.rsqrt %18 : vector<128x1xf32>
    %20 = vector.broadcast %9 : vector<128x1xf32> to vector<128x128xf32>
    %21 = arith.subf %5, %20 : vector<128x128xf32>
    %22 = vector.broadcast %19 : vector<128x1xf32> to vector<128x128xf32>
    %23 = arith.mulf %21, %22 : vector<128x128xf32>
    %c0_10 = arith.constant 0 : index
    %c0_11 = arith.constant 0 : index
    %24 = vector.load %arg4[%c0_10, %c0_11] : memref<1x128xf32, #tpu.memory_space<vmem>>, vector<1x128xf32>
    %25 = vector.broadcast %24 : vector<1x128xf32> to vector<128x128xf32>
    %26 = arith.mulf %23, %25 : vector<128x128xf32>
    %c0_12 = arith.constant 0 : index
    %c0_13 = arith.constant 0 : index
    %27 = vector.load %arg5[%c0_12, %c0_13] : memref<1x128xf32, #tpu.memory_space<vmem>>, vector<1x128xf32>
    %28 = vector.broadcast %27 : vector<1x128xf32> to vector<128x128xf32>
    %29 = arith.addf %26, %28 : vector<128x128xf32>
    %c0_14 = arith.constant 0 : index
    %c0_15 = arith.constant 0 : index
    %30 = vector.load %arg6[%c0_14, %c0_15] : memref<128x128xf32, #tpu.memory_space<vmem>>, vector<128x128xf32>
    tpu.vector_store %arg6[%c0_14, %c0_15], %29 {strides = array<i32>} : memref<128x128xf32, #tpu.memory_space<vmem>>, vector<128x128xf32>,
    return
  }
  func.func @transform_0(%arg0: i32) -> (i32, i32) {
    %c0_i32 = arith.constant 0 : i32
    %c0_i32_0 = arith.constant 0 : i32
    return %arg0, %c0_i32 : i32, i32
  }
  func.func @transform_1(%arg0: i32) -> (i32, i32) {
    %c0_i32 = arith.constant 0 : i32
    %c0_i32_0 = arith.constant 0 : i32
    %c0_i32_1 = arith.constant 0 : i32
    return %c0_i32, %c0_i32_0 : i32, i32
  }
  func.func @transform_2(%arg0: i32) -> (i32, i32) {
    %c0_i32 = arith.constant 0 : i32
    %c0_i32_0 = arith.constant 0 : i32
    %c0_i32_1 = arith.constant 0 : i32
    return %c0_i32, %c0_i32_0 : i32, i32
  }
  func.func @transform_3(%arg0: i32) -> (i32, i32) {
    %c0_i32 = arith.constant 0 : i32
    %c0_i32_0 = arith.constant 0 : i32
    %c0_i32_1 = arith.constant 0 : i32
    return %c0_i32, %c0_i32_0 : i32, i32
  }
  func.func @transform_4(%arg0: i32) -> (i32, i32) {
    %c0_i32 = arith.constant 0 : i32
    %c0_i32_0 = arith.constant 0 : i32
    %c0_i32_1 = arith.constant 0 : i32
    return %c0_i32, %c0_i32_0 : i32, i32
  }
  func.func @transform_5(%arg0: i32) -> (i32, i32) {
    %c0_i32 = arith.constant 0 : i32
    %c0_i32_0 = arith.constant 0 : i32
    return %arg0, %c0_i32 : i32, i32
  }
}

</mosaic_0001>

<bundles_post_ra>
// kernel: tpu_custom_call.1
= control target key start
LH: loop header
LB: loop body
LE: loop exit
PB: predicated region body
PF: predicated region fallthrough
CT: control target
= control target key end

     0   :  { %vm43_vm0 = vcmask 130048   ;;  %s1082_s0 = inlined_call_operand.vmem [shape: f32[128,16], index: 0, kind: input, shape index: {}]   ;;  %s1083_s1 = inlined_call_operand.vmem [shape: f32[16,128], index: 1, kind: input, shape index: {}]   ;;  %s1084_s2 = inlined_call_operand.vmem [shape: f32[1,128], index: 2, kind: input, shape index: {}]   ;;  %s1085_s3 = inlined_call_operand.vmem [shape: f32[1,128], index: 3, kind: input, shape index: {}]   ;;  %s1086_s4 = inlined_call_operand.vmem [shape: f32[1,128], index: 4, kind: input, shape index: {}]   ;;  %s1087_s5 = inlined_call_operand.hbm [shape: f32[128,128], index: 5, kind: output, shape index: {}]  }
   0x1   :  { %v38_v0 = vld [vmem:[%s1083_s1 + $0x8] sm:$0xff]  ;;  %v37_v1 = vld [vmem:[%s1083_s1] sm:$0xff] }
   0x2   :  { %106 = vmatpush.msra.mxu0 %v38_v0  ;;  %599 = vmatpush.msra.mxu1 %v38_v0  ;;  %v21_v2 = vld [vmem:[%s1082_s0] sm:$0xff] }
   0x3   :  { %v25_v3 = vld [vmem:[%s1082_s0 + $0x20] sm:$0xff]  ;;  %601 = vmatpush.msra.mxu3 %v38_v0  ;;  %600 = vmatpush.msra.mxu2 %v38_v0 }
   0x4   :  { %107 = vmatpush.msra.mxu0 %v37_v1  ;;  %602 = vmatpush.msra.mxu1 %v37_v1  ;;  %v33_v4 = vld [vmem:[%s1082_s0 + $0x60] sm:$0xff] }
   0x5   :  { %v29_v5 = vld [vmem:[%s1082_s0 + $0x40] sm:$0xff]  ;;  %583 = vmatmul.msk.f32.vlgmr.msra.gmra.mxu0 %vm43_vm0, %v21_v2  ;;  %587 = vmatmul.msk.f32.vlgmr.msra.gmra.mxu1 %vm43_vm0, %v25_v3 }
   0x6   :  { %604 = vmatpush.msra.mxu3 %v37_v1  ;;  %603 = vmatpush.msra.mxu2 %v37_v1 }
   0x7   :  { %595 = vmatmul.msk.f32.vlgmr.msra.gmra.mxu3 %vm43_vm0, %v33_v4  ;;  %591 = vmatmul.msk.f32.vlgmr.msra.gmra.mxu2 %vm43_vm0, %v29_v5 }
   0x8   :  { %10 = vsyncpa [#allocation3], 0  ;;  %v22_v6 = vld [vmem:[%s1082_s0 + $0x8] sm:$0xff]  ;;  %v23_v10 = vld [vmem:[%s1082_s0 + $0x10] sm:$0xff]  ;;  %s571_s8 = sshll.u32 %s1087_s5, 4  ;;  %s670_s9 = smov 128   ;;  %s572_s8 = int_to_ptr.hbm [resolvable:$true] %s571_s8 }
   0x9   :  { %v26_v7 = vld [vmem:[%s1082_s0 + $0x28] sm:$0xff]  ;;  %v27_v11 = vld [vmem:[%s1082_s0 + $0x30] sm:$0xff]  ;;  %v28_v14 = vld [vmem:[%s1082_s0 + $0x38] sm:$0xff]  ;;  %s671_s10 = smov 8  }
   0xa   :  { %v34_v8 = vld [vmem:[%s1082_s0 + $0x68] sm:$0xff]  ;;  %v35_v12 = vld [vmem:[%s1082_s0 + $0x70] sm:$0xff]  ;;  %v24_v15 = vld [vmem:[%s1082_s0 + $0x18] sm:$0xff] }
   0xb   :  { %v30_v9 = vld [vmem:[%s1082_s0 + $0x48] sm:$0xff]  ;;  %v31_v13 = vld [vmem:[%s1082_s0 + $0x50] sm:$0xff]  ;;  %v32_v16 = vld [vmem:[%s1082_s0 + $0x58] sm:$0xff] }
   0xc   :  { %v36_v17 = vld [vmem:[%s1082_s0 + $0x78] sm:$0xff]  ;;  %v775_v18 = vld [vmem:[%s1084_s2] ss:$0 sm:$0xff] }
   0xd   :  { %584 = vmatmul.msk.f32.gmra.mxu0 %vm43_vm0, %v22_v6  ;;  %588 = vmatmul.msk.f32.gmra.mxu1 %vm43_vm0, %v26_v7 }
   0xf   :  { %596 = vmatmul.msk.f32.gmra.mxu3 %vm43_vm0, %v34_v8  ;;  %592 = vmatmul.msk.f32.gmra.mxu2 %vm43_vm0, %v30_v9 }
  0x15   :  { %585 = vmatmul.msk.f32.gmra.mxu0 %vm43_vm0, %v23_v10  ;;  %589 = vmatmul.msk.f32.gmra.mxu1 %vm43_vm0, %v27_v11 }
  0x17   :  { %597 = vmatmul.msk.f32.gmra.mxu3 %vm43_vm0, %v35_v12  ;;  %593 = vmatmul.msk.f32.gmra.mxu2 %vm43_vm0, %v31_v13 }
  0x1d   :  { %590 = vmatmul.msk.f32.gmra.mxu1 %vm43_vm0, %v28_v14  ;;  %586 = vmatmul.msk.f32.gmra.mxu0 %vm43_vm0, %v24_v15 }
  0x1f   :  { %594 = vmatmul.msk.f32.gmra.mxu2 %vm43_vm0, %v32_v16  ;;  %598 = vmatmul.msk.f32.gmra.mxu3 %vm43_vm0, %v36_v17 }
  0x82   :  { %v109_v19 = vpop.f32.mrf.mxu0  ;;  %v121_v20 = vpop.f32.mrf.mxu1 }
  0x83   :  { %v778_v21 = vadd.f32 %v775_v18, %v109_v19  ;;  %v781_v22 = vadd.f32 %v775_v18, %v121_v20 }
  0x85   :  { %165 = vadd.xlane.f32.xlu2 %v781_v22  ;;  %157 = vadd.xlane.f32.xlu0 %v778_v21  ;;  %v205_v23 = vmul.f32 %v778_v21, %v778_v21  ;;  %v209_v24 = vmul.f32 %v781_v22, %v781_v22 }
  0x87   :  { %221 = vadd.xlane.f32.xlu1 %v205_v23 }
  0x8a   :  { %v145_v25 = vpop.f32.mrf.mxu3  ;;  %v112_v28 = vpop.f32.mrf.mxu0 }
  0x8b   :  { %v790_v26 = vadd.f32 %v775_v18, %v145_v25  ;;  %v133_v29 = vpop.f32.mrf.mxu2  ;;  %v796_v30 = vadd.f32 %v775_v18, %v112_v28  ;;  %v124_v34 = vpop.f32.mrf.mxu1 }
  0x8c   :  { %v799_v31 = vadd.f32 %v775_v18, %v133_v29  ;;  %v808_v36 = vadd.f32 %v775_v18, %v124_v34 }
  0x8d   :  { %229 = vadd.xlane.f32.xlu2 %v209_v24  ;;  %181 = vadd.xlane.f32.xlu0 %v790_v26  ;;  %v217_v27 = vmul.f32 %v790_v26, %v790_v26  ;;  %v206_v42 = vmul.f32 %v796_v30, %v796_v30 }
  0x8e   :  { %v213_v37 = vmul.f32 %v799_v31, %v799_v31  ;;  %v210_v41 = vmul.f32 %v808_v36, %v808_v36 }
  0x8f   :  { %245 = vadd.xlane.f32.xlu1 %v217_v27 }
  0x92   :  { %v148_v32 = vpop.f32.mrf.mxu3  ;;  %v115_v35 = vpop.f32.mrf.mxu0 }
  0x93   :  { %v802_v33 = vadd.f32 %v775_v18, %v148_v32  ;;  %v813_v38 = vadd.f32 %v775_v18, %v115_v35  ;;  %v136_v39 = vpop.f32.mrf.mxu2  ;;  %v127_v44 = vpop.f32.mrf.mxu1 }
  0x94   :  { %v818_v40 = vadd.f32 %v775_v18, %v136_v39  ;;  %v827_v46 = vadd.f32 %v775_v18, %v127_v44 }
  0x95   :  { %173 = vadd.xlane.f32.xlu2 %v799_v31  ;;  %159 = vadd.xlane.f32.xlu0 %v796_v30  ;;  %v207_v57 = vmul.f32 %v813_v38, %v813_v38  ;;  %v218_v63 = vmul.f32 %v802_v33, %v802_v33 }
  0x96   :  { %v214_v43 = vmul.f32 %v818_v40, %v818_v40  ;;  %v211_v49 = vmul.f32 %v827_v46, %v827_v46 }
  0x97   :  { %183 = vadd.xlane.f32.xlu1 %v802_v33 }
  0x9a   :  { %v151_v45 = vpop.f32.mrf.mxu3  ;;  %v118_v54 = vpop.f32.mrf.mxu0 }
  0x9b   :  { %v830_v47 = vadd.f32 %v775_v18, %v151_v45  ;;  %v139_v48 = vpop.f32.mrf.mxu2  ;;  %v130_v52 = vpop.f32.mrf.mxu1  ;;  %v849_v56 = vadd.f32 %v775_v18, %v118_v54 }
  0x9c   :  { %v837_v50 = vadd.f32 %v775_v18, %v139_v48  ;;  %v843_v53 = vadd.f32 %v775_v18, %v130_v52 }
  0x9d   :  { %167 = vadd.xlane.f32.xlu2 %v808_v36  ;;  %237 = vadd.xlane.f32.xlu0 %v213_v37  ;;  %v208_v0 = vmul.f32 %v849_v56, %v849_v56  ;;  %v219_v1 = vmul.f32 %v830_v47, %v830_v47 }
  0x9e   :  { %v215_v51 = vmul.f32 %v837_v50, %v837_v50  ;;  %v212_v55 = vmul.f32 %v843_v53, %v843_v53 }
  0x9f   :  { %161 = vadd.xlane.f32.xlu1 %v813_v38 }
  0xa2   :  { %v154_v59 = vpop.f32.mrf.mxu3 }
  0xa3   :  { %v142_v58 = vpop.f32.mrf.mxu2  ;;  %v858_v61 = vadd.f32 %v775_v18, %v154_v59 }
  0xa4   :  { %v855_v60 = vadd.f32 %v775_v18, %v142_v58  ;;  %v891_v58 = vld [vmem:[%s1085_s3] ss:$0 sm:$0xff]  ;;  %s669_s3 = smov [#allocation2]  }
  0xa5   :  { %223 = vadd.xlane.f32.xlu2 %v206_v42  ;;  %231 = vadd.xlane.f32.xlu0 %v210_v41  ;;  %v220_v2 = vmul.f32 %v858_v61, %v858_v61 }
  0xa6   :  { %v216_v62 = vmul.f32 %v855_v60, %v855_v60 }
  0xa7   :  { %239 = vadd.xlane.f32.xlu1 %v214_v43 }
  0xad   :  { %185 = vadd.xlane.f32.xlu2 %v830_v47  ;;  %175 = vadd.xlane.f32.xlu0 %v818_v40 }
  0xaf   :  { %233 = vadd.xlane.f32.xlu1 %v211_v49 }
  0xb5   :  { %241 = vadd.xlane.f32.xlu2 %v215_v51  ;;  %169 = vadd.xlane.f32.xlu0 %v827_v46 }
  0xb7   :  { %177 = vadd.xlane.f32.xlu1 %v837_v50 }
  0xbd   :  { %235 = vadd.xlane.f32.xlu2 %v212_v55  ;;  %225 = vadd.xlane.f32.xlu0 %v207_v57 }
  0xbf   :  { %163 = vadd.xlane.f32.xlu1 %v849_v56 }
  0xc5   :  { %179 = vadd.xlane.f32.xlu2 %v855_v60  ;;  %187 = vadd.xlane.f32.xlu0 %v858_v61 }
  0xc7   :  { %171 = vadd.xlane.f32.xlu1 %v843_v53 }
  0xcd   :  { %247 = vadd.xlane.f32.xlu2 %v218_v63  ;;  %243 = vadd.xlane.f32.xlu0 %v216_v62 }
  0xcf   :  { %227 = vadd.xlane.f32.xlu1 %v208_v0 }
  0xd5   :  { %249 = vadd.xlane.f32.xlu0 %v219_v1 }
  0xd7   :  { %251 = vadd.xlane.f32.xlu1 %v220_v2  ;;  %v898_v2 = vld [vmem:[%s1086_s4] ss:$0 sm:$0xff]  ;;  %s569_s4 = sshll.u32 %s669_s3, 4  ;;  %s570_s4 = int_to_ptr.vmem [resolvable:$true] %s569_s4 }
  0xf8   :  { %v166_v3 = vpop.xlane.xlu2 %165  ;;  %v158_v4 = vpop.xlane.xlu0 %157 }
  0xf9   :  { %v189_v5 = vmul.f32 0.03125, %v158_v4  ;;  %v873_v9 = vmul.f32 0.03125, %v166_v3 }
  0xfa   :  { %v222_v6 = vpop.xlane.xlu1 %221 }
  0xfb   :  { %v269_v7 = vmul.f32 %v189_v5, %v189_v5  ;;  %v253_v8 = vmul.f32 0.03125, %v222_v6  ;;  %v273_v11 = vmul.f32 %v873_v9, %v873_v9  ;;  %v477_v57 = vsub.f32 %v778_v21, %v189_v5 }
  0xfc   :  { %v481_v5 = vsub.f32 %v781_v22, %v873_v9 }
  0xfd   :  { %v285_v10 = vsub.f32 %v253_v8, %v269_v7 }
  0xff   :  { %v301_v12 = vadd.f32 1e-06, %v285_v10 }
 0x100   :  { %v230_v13 = vpop.xlane.xlu2 %229  ;;  %v182_v14 = vpop.xlane.xlu0 %181 }
 0x101   :  { %v257_v15 = vmul.f32 0.03125, %v230_v13  ;;  %v877_v16 = vmul.f32 0.03125, %v182_v14  ;;  %611 = vrsqrt.f32 %v301_v12  ;;  %vm323_vm2 = vweird.f32 %v301_v12 }
 0x102   :  { %v246_v17 = vpop.xlane.xlu1 %245 }
 0x103   :  { %v289_v18 = vsub.f32 %v257_v15, %v273_v11  ;;  %v281_v19 = vmul.f32 %v877_v16, %v877_v16  ;;  %v265_v20 = vmul.f32 0.03125, %v246_v17 }
 0x105   :  { %v305_v23 = vadd.f32 1e-06, %v289_v18  ;;  %v297_v24 = vsub.f32 %v265_v20, %v281_v19 }
 0x107   :  { %613 = vrsqrt.f32 %v305_v23  ;;  %v313_v25 = vadd.f32 1e-06, %v297_v24  ;;  %v612_v27 = vpop.eup %611  ;;  %vm363_vm5 = vweird.f32 %v305_v23 }
 0x108   :  { %v174_v28 = vpop.xlane.xlu2 %173  ;;  %v160_v29 = vpop.xlane.xlu0 %159  ;;  %v318_v32 = vmul.f32 %v612_v27, %v301_v12  ;;  %vm324_vm1 = vweird.f32 %v612_v27  ;;  %v489_v12 = vsub.f32 %v790_v26, %v877_v16 }
 0x109   :  { %615 = vrsqrt.f32 %v313_v25  ;;  %v883_v41 = vmul.f32 0.03125, %v174_v28  ;;  %vm325_vm3 = vmor %vm323_vm2, %vm324_vm1  ;;  %v907_v13 = vmul.f32 0.03125, %v160_v29  ;;  %vm443_vm8 = vweird.f32 %v313_v25 }
 0x10a   :  { %v881_v34 = vpop.xlane.xlu1 %183  ;;  %v319_v35 = vmul.f32 %v612_v27, %v318_v32 }
 0x10b   :  { %v277_v45 = vmul.f32 %v883_v41, %v883_v41  ;;  %v270_v20 = vmul.f32 %v907_v13, %v907_v13 }
 0x10c   :  { %v320_v39 = vmul.f32 0.5, %v319_v35 }
 0x10d   :  { %v614_v37 = vpop.eup %613 }
 0x10e   :  { %v358_v42 = vmul.f32 %v614_v37, %v305_v23  ;;  %v321_v44 = vsub.f32 1.5, %v320_v39  ;;  %vm364_vm4 = vweird.f32 %v614_v37 }
 0x10f   :  { %v616_v43 = vpop.eup %615  ;;  %vm365_vm7 = vmor %vm363_vm5, %vm364_vm4 }
 0x110   :  { %v359_v48 = vmul.f32 %v614_v37, %v358_v42  ;;  %v438_v49 = vmul.f32 %v616_v43, %v313_v25  ;;  %v168_v51 = vpop.xlane.xlu2 %167  ;;  %v238_v52 = vpop.xlane.xlu0 %237  ;;  %v322_v54 = vmul.f32 %v612_v27, %v321_v44  ;;  %vm444_vm6 = vweird.f32 %v616_v43 }
 0x111   :  { %v261_v55 = vmul.f32 0.03125, %v238_v52  ;;  %v902_v6 = vmul.f32 0.03125, %v168_v51  ;;  %vm445_vm9 = vmor %vm443_vm8, %vm444_vm6 }
 0x112   :  { %v360_v59 = vmul.f32 0.5, %v359_v48  ;;  %v439_v62 = vmul.f32 %v616_v43, %v438_v49  ;;  %v893_v63 = vpop.xlane.xlu1 %161  ;;  %v326_v0 = vsel %vm325_vm3, %v612_v27, %v322_v54 }
 0x113   :  { %v293_v1 = vsub.f32 %v261_v55, %v277_v45  ;;  %v493_v3 = vmul.f32 %v477_v57, %v326_v0  ;;  %v274_v14 = vmul.f32 %v902_v6, %v902_v6 }
 0x114   :  { %v361_v4 = vsub.f32 1.5, %v360_v59  ;;  %v440_v21 = vmul.f32 0.5, %v439_v62 }
 0x115   :  { %v309_v7 = vadd.f32 1e-06, %v293_v1  ;;  %v513_v8 = vmul.f32 %v891_v58, %v493_v3 }
 0x116   :  { %v362_v10 = vmul.f32 %v614_v37, %v361_v4  ;;  %v441_v11 = vsub.f32 1.5, %v440_v21  ;;  %v485_v21 = vsub.f32 %v799_v31, %v883_v41 }
 0x117   :  { %617 = vrsqrt.f32 %v309_v7  ;;  %v533_v22 = vadd.f32 %v898_v2, %v513_v8  ;;  %vm403_vm11 = vweird.f32 %v309_v7 }
 0x118   :  { %v366_v9 = vsel %vm365_vm7, %v614_v37, %v362_v10  ;;  %v442_v15 = vmul.f32 %v616_v43, %v441_v11  ;;  %v224_v17 = vpop.xlane.xlu2 %223  ;;  %v232_v18 = vpop.xlane.xlu0 %231 }
 0x119   :  { %v497_v19 = vmul.f32 %v481_v5, %v366_v9  ;;  %v254_v23 = vmul.f32 0.03125, %v224_v17  ;;  %v258_v26 = vmul.f32 0.03125, %v232_v18  ;;  %549 = vst [vmem:[#allocation2] sm:$0xff] %v533_v22 }
 0x11a   :  { %v446_v16 = vsel %vm445_vm9, %v616_v43, %v442_v15  ;;  %v240_v24 = vpop.xlane.xlu1 %239 }
 0x11b   :  { %v517_v27 = vmul.f32 %v891_v58, %v497_v19  ;;  %v505_v28 = vmul.f32 %v489_v12, %v446_v16  ;;  %v286_v29 = vsub.f32 %v254_v23, %v270_v20  ;;  %v290_v32 = vsub.f32 %v258_v26, %v274_v14 }
 0x11c   :  { %v262_v55 = vmul.f32 0.03125, %v240_v24 }
 0x11d   :  { %v618_v35 = vpop.eup %617  ;;  %v537_v25 = vadd.f32 %v898_v2, %v517_v27  ;;  %v525_v37 = vmul.f32 %v891_v58, %v505_v28  ;;  %v302_v39 = vadd.f32 1e-06, %v286_v29  ;;  %v917_v42 = vadd.f32 1e-06, %v290_v32 }
 0x11e   :  { %v398_v44 = vmul.f32 %v618_v35, %v309_v7  ;;  %vm404_vm10 = vweird.f32 %v618_v35  ;;  %v478_v28 = vsub.f32 %v796_v30, %v907_v13 }
 0x11f   :  { %553 = vst [vmem:[#allocation2 + $0x20] sm:$0xff] %v537_v25  ;;  %v545_v45 = vadd.f32 %v898_v2, %v525_v37  ;;  %619 = vrsqrt.f32 %v302_v39  ;;  %vm405_vm12 = vmor %vm403_vm11, %vm404_vm10  ;;  %vm333_vm15 = vweird.f32 %v302_v39  ;;  %v946_v25 = vmul.f32 0.03125, %v893_v63 }
 0x120   :  { %v399_v43 = vmul.f32 %v618_v35, %v398_v44  ;;  %621 = vrsqrt.f32 %v917_v42  ;;  %v921_v48 = vpop.xlane.xlu2 %185  ;;  %v176_v49 = vpop.xlane.xlu0 %175  ;;  %vm373_vm1 = vweird.f32 %v917_v42 }
 0x121   :  { %561 = vst [vmem:[#allocation2 + $0x60] sm:$0xff] %v545_v45  ;;  %v923_v51 = vmul.f32 0.03125, %v176_v49  ;;  %v482_v45 = vsub.f32 %v808_v36, %v902_v6  ;;  %v271_v36 = vmul.f32 %v946_v25, %v946_v25 }
 0x122   :  { %v400_v52 = vmul.f32 0.5, %v399_v43  ;;  %v234_v54 = vpop.xlane.xlu1 %233 }
 0x123   :  { %v278_v57 = vmul.f32 %v923_v51, %v923_v51  ;;  %v259_v23 = vmul.f32 0.03125, %v234_v54 }
 0x124   :  { %v401_v59 = vsub.f32 1.5, %v400_v52 }
 0x125   :  { %v620_v62 = vpop.eup %619  ;;  %v294_v0 = vsub.f32 %v262_v55, %v278_v57 }
 0x126   :  { %v622_v1 = vpop.eup %621  ;;  %v402_v3 = vmul.f32 %v618_v35, %v401_v59  ;;  %v328_v4 = vmul.f32 %v620_v62, %v302_v39  ;;  %vm334_vm13 = vweird.f32 %v620_v62 }
 0x127   :  { %v368_v5 = vmul.f32 %v622_v1, %v917_v42  ;;  %v930_v8 = vadd.f32 1e-06, %v294_v0  ;;  %vm374_vm14 = vweird.f32 %v622_v1  ;;  %vm335_vm0 = vmor %vm333_vm15, %vm334_vm13 }
 0x128   :  { %v406_v10 = vsel %vm405_vm12, %v618_v35, %v402_v3  ;;  %v329_v11 = vmul.f32 %v620_v62, %v328_v4  ;;  %v242_v12 = vpop.xlane.xlu2 %241  ;;  %v170_v14 = vpop.xlane.xlu0 %169  ;;  %vm375_vm2 = vmor %vm373_vm1, %vm374_vm14 }
 0x129   :  { %v501_v22 = vmul.f32 %v485_v21, %v406_v10  ;;  %v369_v9 = vmul.f32 %v622_v1, %v368_v5  ;;  %623 = vrsqrt.f32 %v930_v8  ;;  %v933_v17 = vmul.f32 0.03125, %v170_v14 }
 0x12a   :  { %v330_v15 = vmul.f32 0.5, %v329_v11  ;;  %v178_v7 = vpop.xlane.xlu1 %177  ;;  %v263_v41 = vmul.f32 0.03125, %v242_v12  ;;  %v968_v11 = vmul.f32 0.03125, %v881_v34  ;;  %vm413_vm4 = vweird.f32 %v930_v8 }
 0x12b   :  { %v521_v18 = vmul.f32 %v891_v58, %v501_v22  ;;  %v370_v31 = vmul.f32 0.5, %v369_v9  ;;  %v936_v19 = vmul.f32 0.03125, %v178_v7  ;;  %v275_v26 = vmul.f32 %v933_v17, %v933_v17 }
 0x12c   :  { %v331_v20 = vsub.f32 1.5, %v330_v15  ;;  %v486_v15 = vsub.f32 %v818_v40, %v923_v51 }
 0x12d   :  { %v541_v16 = vadd.f32 %v898_v2, %v521_v18  ;;  %v371_v24 = vsub.f32 1.5, %v370_v31  ;;  %v279_v27 = vmul.f32 %v936_v19, %v936_v19  ;;  %v291_v32 = vsub.f32 %v259_v23, %v275_v26 }
 0x12e   :  { %v332_v29 = vmul.f32 %v620_v62, %v331_v20  ;;  %v483_v26 = vsub.f32 %v827_v46, %v933_v17  ;;  %v487_v40 = vsub.f32 %v837_v50, %v936_v19 }
 0x12f   :  { %v624_v35 = vpop.eup %623  ;;  %557 = vst [vmem:[#allocation2 + $0x40] sm:$0xff] %v541_v16  ;;  %v372_v37 = vmul.f32 %v622_v1, %v371_v24  ;;  %v295_v44 = vsub.f32 %v263_v41, %v279_v27  ;;  %v953_v13 = vadd.f32 1e-06, %v291_v32 }
 0x130   :  { %v336_v43 = vsel %vm335_vm0, %v620_v62, %v332_v29  ;;  %v408_v30 = vmul.f32 %v624_v35, %v930_v8  ;;  %v236_v39 = vpop.xlane.xlu2 %235  ;;  %v226_v49 = vpop.xlane.xlu0 %225  ;;  %vm414_vm3 = vweird.f32 %v624_v35  ;;  %v282_v8 = vmul.f32 %v968_v11, %v968_v11 }
 0x131   :  { %v494_v52 = vmul.f32 %v478_v28, %v336_v43  ;;  %v376_v63 = vsel %vm375_vm2, %v622_v1, %v372_v37  ;;  %v955_v54 = vadd.f32 1e-06, %v295_v44  ;;  %625 = vrsqrt.f32 %v953_v13  ;;  %vm415_vm5 = vmor %vm413_vm4, %vm414_vm3 }
 0x132   :  { %v498_v55 = vmul.f32 %v482_v45, %v376_v63  ;;  %v409_v57 = vmul.f32 %v624_v35, %v408_v30  ;;  %v164_v42 = vpop.xlane.xlu1 %163  ;;  %v255_v59 = vmul.f32 0.03125, %v226_v49  ;;  %v260_v27 = vmul.f32 0.03125, %v236_v39 }
 0x133   :  { %v514_v6 = vmul.f32 %v891_v58, %v494_v52  ;;  %627 = vrsqrt.f32 %v955_v54  ;;  %vm383_vm6 = vweird.f32 %v953_v13  ;;  %v990_v32 = vmul.f32 0.03125, %v164_v42 }
 0x134   :  { %v518_v62 = vmul.f32 %v891_v58, %v498_v55  ;;  %v410_v0 = vmul.f32 0.5, %v409_v57  ;;  %v287_v3 = vsub.f32 %v255_v59, %v271_v36  ;;  %vm423_vm9 = vweird.f32 %v955_v54 }
 0x135   :  { %v534_v1 = vadd.f32 %v898_v2, %v514_v6  ;;  %v272_v57 = vmul.f32 %v990_v32, %v990_v32 }
 0x136   :  { %v538_v4 = vadd.f32 %v898_v2, %v518_v62  ;;  %v411_v21 = vsub.f32 1.5, %v410_v0  ;;  %v965_v5 = vadd.f32 1e-06, %v287_v3 }
 0x137   :  { %550 = vst [vmem:[#allocation2 + $0x8] sm:$0xff] %v534_v1  ;;  %v626_v10 = vpop.eup %625 }
 0x138   :  { %554 = vst [vmem:[#allocation2 + $0x28] sm:$0xff] %v538_v4  ;;  %v412_v12 = vmul.f32 %v624_v35, %v411_v21  ;;  %v180_v14 = vpop.xlane.xlu2 %179  ;;  %v971_v22 = vpop.xlane.xlu0 %187  ;;  %v378_v7 = vmul.f32 %v626_v10, %v953_v13  ;;  %629 = vrsqrt.f32 %v965_v5  ;;  %vm384_vm7 = vweird.f32 %v626_v10 }
 0x139   :  { %v628_v9 = vpop.eup %627  ;;  %v987_v28 = vmul.f32 0.03125, %v180_v14  ;;  %vm385_vm10 = vmor %vm383_vm6, %vm384_vm7  ;;  %vm343_vm13 = vweird.f32 %v965_v5 }
 0x13a   :  { %v416_v18 = vsel %vm415_vm5, %v624_v35, %v412_v12  ;;  %v418_v34 = vmul.f32 %v628_v9, %v955_v54  ;;  %v172_v31 = vpop.xlane.xlu1 %171  ;;  %v379_v20 = vmul.f32 %v626_v10, %v378_v7  ;;  %vm424_vm8 = vweird.f32 %v628_v9 }
 0x13b   :  { %v502_v41 = vmul.f32 %v486_v15, %v416_v18  ;;  %v978_v23 = vmul.f32 0.03125, %v172_v31  ;;  %v280_v50 = vmul.f32 %v987_v28, %v987_v28  ;;  %vm425_vm11 = vmor %vm423_vm9, %vm424_vm8  ;;  %v1013_v15 = vmul.f32 0.03125, %v921_v48 }
 0x13c   :  { %v419_v16 = vmul.f32 %v628_v9, %v418_v34  ;;  %v380_v24 = vmul.f32 0.5, %v379_v20 }
 0x13d   :  { %v522_v51 = vmul.f32 %v891_v58, %v502_v41  ;;  %v276_v35 = vmul.f32 %v978_v23, %v978_v23  ;;  %v479_v41 = vsub.f32 %v813_v38, %v946_v25  ;;  %v283_v48 = vmul.f32 %v1013_v15, %v1013_v15 }
 0x13e   :  { %v420_v29 = vmul.f32 0.5, %v419_v16  ;;  %v630_v37 = vpop.eup %629  ;;  %v381_v17 = vsub.f32 1.5, %v380_v24  ;;  %v1028_v16 = vmul.f32 0.03125, %v971_v22 }
 0x13f   :  { %v542_v46 = vadd.f32 %v898_v2, %v522_v51  ;;  %v338_v44 = vmul.f32 %v630_v37, %v965_v5  ;;  %v292_v45 = vsub.f32 %v260_v27, %v276_v35  ;;  %vm344_vm12 = vweird.f32 %v630_v37 }
 0x140   :  { %v421_v19 = vsub.f32 1.5, %v420_v29  ;;  %v248_v43 = vpop.xlane.xlu2 %247  ;;  %v244_v30 = vpop.xlane.xlu0 %243  ;;  %v382_v39 = vmul.f32 %v626_v10, %v381_v17  ;;  %vm345_vm14 = vmor %vm343_vm13, %vm344_vm12  ;;  %v284_v24 = vmul.f32 %v1028_v16, %v1028_v16 }
 0x141   :  { %558 = vst [vmem:[#allocation2 + $0x48] sm:$0xff] %v542_v46  ;;  %v266_v49 = vmul.f32 0.03125, %v248_v43  ;;  %v264_v52 = vmul.f32 0.03125, %v244_v30  ;;  %v339_v55 = vmul.f32 %v630_v37, %v338_v44  ;;  %v1003_v42 = vadd.f32 1e-06, %v292_v45 }
 0x142   :  { %v422_v63 = vmul.f32 %v628_v9, %v421_v19  ;;  %v228_v36 = vpop.xlane.xlu1 %227  ;;  %v386_v6 = vsel %vm385_vm10, %v626_v10, %v382_v39 }
 0x143   :  { %v298_v59 = vsub.f32 %v266_v49, %v282_v8  ;;  %v296_v62 = vsub.f32 %v264_v52, %v280_v50  ;;  %v256_v0 = vmul.f32 0.03125, %v228_v36  ;;  %v499_v54 = vmul.f32 %v483_v26, %v386_v6 }
 0x144   :  { %v426_v1 = vsel %vm425_vm11, %v628_v9, %v422_v63  ;;  %v340_v3 = vmul.f32 0.5, %v339_v55  ;;  %631 = vrsqrt.f32 %v1003_v42  ;;  %vm393_vm0 = vweird.f32 %v1003_v42 }
 0x145   :  { %v503_v13 = vmul.f32 %v487_v40, %v426_v1  ;;  %v1007_v4 = vadd.f32 1e-06, %v298_v59  ;;  %v1009_v21 = vadd.f32 1e-06, %v296_v62  ;;  %v519_v12 = vmul.f32 %v891_v58, %v499_v54 }
 0x146   :  { %v341_v14 = vsub.f32 1.5, %v340_v3  ;;  %v288_v10 = vsub.f32 %v256_v0, %v272_v57  ;;  %v490_v59 = vsub.f32 %v802_v33, %v968_v11  ;;  %v484_v62 = vsub.f32 %v843_v53, %v978_v23 }
 0x147   :  { %v523_v7 = vmul.f32 %v891_v58, %v503_v13  ;;  %633 = vrsqrt.f32 %v1007_v4  ;;  %v539_v9 = vadd.f32 %v898_v2, %v519_v12  ;;  %vm453_vm4 = vweird.f32 %v1007_v4 }
 0x148   :  { %v342_v18 = vmul.f32 %v630_v37, %v341_v14  ;;  %635 = vrsqrt.f32 %v1009_v21  ;;  %v1020_v34 = vadd.f32 1e-06, %v288_v10  ;;  %v250_v31 = vpop.xlane.xlu0 %249  ;;  %vm433_vm5 = vweird.f32 %v1009_v21 }
 0x149   :  { %v543_v20 = vadd.f32 %v898_v2, %v523_v7  ;;  %v267_v5 = vmul.f32 0.03125, %v250_v31  ;;  %555 = vst [vmem:[#allocation2 + $0x30] sm:$0xff] %v539_v9  ;;  %v488_v23 = vsub.f32 %v855_v60, %v987_v28  ;;  %v480_v31 = vsub.f32 %v849_v56, %v990_v32 }
 0x14a   :  { %v632_v8 = vpop.eup %631  ;;  %v346_v26 = vsel %vm345_vm14, %v630_v37, %v342_v18  ;;  %637 = vrsqrt.f32 %v1020_v34  ;;  %v252_v40 = vpop.xlane.xlu1 %251  ;;  %vm353_vm9 = vweird.f32 %v1020_v34 }
 0x14b   :  { %559 = vst [vmem:[#allocation2 + $0x50] sm:$0xff] %v543_v20  ;;  %v495_v51 = vmul.f32 %v479_v41, %v346_v26  ;;  %v388_v38 = vmul.f32 %v632_v8, %v1003_v42  ;;  %v299_v25 = vsub.f32 %v267_v5, %v283_v48  ;;  %v268_v27 = vmul.f32 0.03125, %v252_v40 }
 0x14c   :  { %vm394_vm15 = vweird.f32 %v632_v8 }
 0x14d   :  { %v634_v29 = vpop.eup %633  ;;  %v515_v35 = vmul.f32 %v891_v58, %v495_v51  ;;  %v389_v46 = vmul.f32 %v632_v8, %v388_v38  ;;  %v1035_v37 = vadd.f32 1e-06, %v299_v25  ;;  %v300_v50 = vsub.f32 %v268_v27, %v284_v24  ;;  %vm395_vm1 = vmor %vm393_vm0, %vm394_vm15 }
 0x14e   :  { %v636_v22 = vpop.eup %635  ;;  %v448_v17 = vmul.f32 %v634_v29, %v1007_v4  ;;  %vm454_vm2 = vweird.f32 %v634_v29  ;;  %v491_v24 = vsub.f32 %v830_v47, %v1013_v15 }
 0x14f   :  { %v535_v19 = vadd.f32 %v898_v2, %v515_v35  ;;  %v390_v44 = vmul.f32 0.5, %v389_v46  ;;  %v428_v45 = vmul.f32 %v636_v22, %v1009_v21  ;;  %639 = vrsqrt.f32 %v1035_v37  ;;  %vm455_vm6 = vmor %vm453_vm4, %vm454_vm2 }
 0x150   :  { %v638_v43 = vpop.eup %637  ;;  %v449_v30 = vmul.f32 %v634_v29, %v448_v17  ;;  %v1041_v39 = vadd.f32 1e-06, %v300_v50  ;;  %vm434_vm3 = vweird.f32 %v636_v22  ;;  %vm463_vm12 = vweird.f32 %v1035_v37 }
 0x151   :  { %551 = vst [vmem:[#allocation2 + $0x10] sm:$0xff] %v535_v19  ;;  %v391_v49 = vsub.f32 1.5, %v390_v44  ;;  %v429_v52 = vmul.f32 %v636_v22, %v428_v45  ;;  %v348_v63 = vmul.f32 %v638_v43, %v1020_v34  ;;  %vm354_vm7 = vweird.f32 %v638_v43  ;;  %vm435_vm8 = vmor %vm433_vm5, %vm434_vm3 }
 0x152   :  { %v450_v55 = vmul.f32 0.5, %v449_v30  ;;  %641 = vrsqrt.f32 %v1041_v39  ;;  %vm355_vm10 = vmor %vm353_vm9, %vm354_vm7  ;;  %vm473_vm15 = vweird.f32 %v1041_v39  ;;  %v492_v17 = vsub.f32 %v858_v61, %v1028_v16 }
 0x153   :  { %v392_v57 = vmul.f32 %v632_v8, %v391_v49  ;;  %v430_v36 = vmul.f32 0.5, %v429_v52  ;;  %v349_v6 = vmul.f32 %v638_v43, %v348_v63 }
 0x154   :  { %v451_v0 = vsub.f32 1.5, %v450_v55 }
 0x155   :  { %v396_v54 = vsel %vm395_vm1, %v632_v8, %v392_v57  ;;  %v431_v1 = vsub.f32 1.5, %v430_v36  ;;  %v350_v3 = vmul.f32 0.5, %v349_v6  ;;  %v640_v13 = vpop.eup %639 }
 0x156   :  { %v500_v12 = vmul.f32 %v484_v62, %v396_v54  ;;  %v452_v14 = vmul.f32 %v634_v29, %v451_v0  ;;  %v458_v11 = vmul.f32 %v640_v13, %v1035_v37  ;;  %vm464_vm11 = vweird.f32 %v640_v13 }
 0x157   :  { %v432_v42 = vmul.f32 %v636_v22, %v431_v1  ;;  %v351_v33 = vsub.f32 1.5, %v350_v3  ;;  %vm465_vm13 = vmor %vm463_vm12, %vm464_vm11 }
 0x158   :  { %v642_v53 = vpop.eup %641  ;;  %v520_v10 = vmul.f32 %v891_v58, %v500_v12  ;;  %v456_v7 = vsel %vm455_vm6, %v634_v29, %v452_v14  ;;  %v459_v18 = vmul.f32 %v640_v13, %v458_v11 }
 0x159   :  { %v506_v4 = vmul.f32 %v490_v59, %v456_v7  ;;  %v436_v9 = vsel %vm435_vm8, %v636_v22, %v432_v42  ;;  %v352_v21 = vmul.f32 %v638_v43, %v351_v33  ;;  %v468_v60 = vmul.f32 %v642_v53, %v1041_v39 }
 0x15a   :  { %v540_v41 = vadd.f32 %v898_v2, %v520_v10  ;;  %v504_v48 = vmul.f32 %v488_v23, %v436_v9  ;;  %v460_v5 = vmul.f32 0.5, %v459_v18  ;;  %vm474_vm14 = vweird.f32 %v642_v53 }
 0x15b   :  { %v526_v28 = vmul.f32 %v891_v58, %v506_v4  ;;  %v356_v20 = vsel %vm355_vm10, %v638_v43, %v352_v21  ;;  %v469_v26 = vmul.f32 %v642_v53, %v468_v60  ;;  %vm475_vm0 = vmor %vm473_vm15, %vm474_vm14 }
 0x15c   :  { %556 = vst [vmem:[#allocation2 + $0x38] sm:$0xff] %v540_v41  ;;  %v524_v34 = vmul.f32 %v891_v58, %v504_v48  ;;  %v496_v8 = vmul.f32 %v480_v31, %v356_v20  ;;  %v461_v51 = vsub.f32 1.5, %v460_v5 }
 0x15d   :  { %v546_v40 = vadd.f32 %v898_v2, %v526_v28  ;;  %v470_v38 = vmul.f32 0.5, %v469_v26 }
 0x15e   :  { %v544_v56 = vadd.f32 %v898_v2, %v524_v34  ;;  %v516_v32 = vmul.f32 %v891_v58, %v496_v8  ;;  %v462_v25 = vmul.f32 %v640_v13, %v461_v51 }
 0x15f   :  { %562 = vst [vmem:[#allocation2 + $0x68] sm:$0xff] %v546_v40  ;;  %v471_v29 = vsub.f32 1.5, %v470_v38 }
 0x160   :  { %560 = vst [vmem:[#allocation2 + $0x58] sm:$0xff] %v544_v56  ;;  %v536_v27 = vadd.f32 %v898_v2, %v516_v32  ;;  %v466_v35 = vsel %vm465_vm13, %v640_v13, %v462_v25 }
 0x161   :  { %v507_v46 = vmul.f32 %v491_v24, %v466_v35  ;;  %v472_v22 = vmul.f32 %v642_v53, %v471_v29 }
 0x162   :  { %552 = vst [vmem:[#allocation2 + $0x18] sm:$0xff] %v536_v27 }
 0x163   :  { %v527_v37 = vmul.f32 %v891_v58, %v507_v46  ;;  %v476_v50 = vsel %vm475_vm0, %v642_v53, %v472_v22 }
 0x164   :  { %v508_v47 = vmul.f32 %v492_v17, %v476_v50 }
 0x165   :  { %v547_v15 = vadd.f32 %v898_v2, %v527_v37 }
 0x166   :  { %v528_v19 = vmul.f32 %v891_v58, %v508_v47 }
 0x167   :  { %563 = vst [vmem:[#allocation2 + $0x70] sm:$0xff] %v547_v15 }
 0x168   :  { %v548_v61 = vadd.f32 %v898_v2, %v528_v19 }
 0x16a   :  { %564 = vst [vmem:[#allocation2 + $0x78] sm:$0xff] %v548_v61 }
 0x16b   :  { %577 = dma.vmem_to_hbm [thread:$0]  %s570_s4, 2048, %s572_s8, [#allocation3], %s670_s9, %s670_s9, %s671_s10  }
 0x16c   :  { %667 = dma.done.wait [#allocation3], 2048  }
 0x16d   :  { %668 = vsyncadd [#allocation3], 4294965248 }
 0x16e   :  { %582 = vsyncpa [#allocation3], 1 }

</bundles_post_ra>
